<compile_context>
chip_gen: v7x
topology: tpu7x:2x2x1
jax: 0.10.0
libtpu: 0.0.40
codegen_flags: <defaults>
</compile_context>

<pallas_src>
import functools

import jax
import jax.numpy as jnp
from jax.experimental import pallas as pl
from jax.experimental.pallas import tpu as pltpu


def _round_up(v, m):
    return ((v + m - 1) // m) * m


def _lse_kernel(x_ref, o_ref, m_ref, s_ref, *, num_classes, tile_c,
                masked_last):
    """Online (flash-style) log-sum-exp over the class axis, one C tile/step."""
    c = pl.program_id(1)
    last = pl.num_programs(1) - 1

    @pl.when(c == 0)
    def _():
        m_ref[...] = jnp.full_like(m_ref, -jnp.inf)   # running row max
        s_ref[...] = jnp.zeros_like(s_ref)            # running sum(exp(x - m))

    def update(xf):
        m_prev = m_ref[...]
        m_new = jnp.maximum(m_prev, jnp.max(xf, axis=-1, keepdims=True))
        p = jnp.exp(xf - m_new)                       # masked lanes -> 0
        s_ref[...] = jnp.exp(m_prev - m_new) * s_ref[...] + jnp.sum(
            p, axis=-1, keepdims=True)
        m_ref[...] = m_new

    xf = x_ref[...].astype(jnp.float32)

    if masked_last:
        # Only the last (ragged) C tile pays for the mask; steady-state tiles
        # run the bare online-LSE update.
        @pl.when(c < last)
        def _():
            update(xf)

        @pl.when(c == last)
        def _():
            cls = (jax.lax.broadcasted_iota(jnp.int32, (1, tile_c), 1)
                   + c * tile_c)
            update(jnp.where(cls < num_classes, xf, -jnp.inf))
    else:
        update(xf)

    @pl.when(c == last)
    def _():
        o_ref[...] = m_ref[...] + jnp.log(s_ref[...])


def _select_tiles(n, c, itemsize):
    """Pick (tile_n, tile_c) against a VMEM budget that is safe on v7x."""
    # Class axis first: long contiguous DMA rows, fewer scratch RMWs per byte.
    tile_c = min(_round_up(c, 128), 8192)
    # Per-row VMEM footprint of a (tile_n, tile_c) block:
    #   * double-buffered logits input: 2 * itemsize
    #   * ~3 full-tile f32 temporaries inside the kernel (cast, exp, selects)
    bytes_per_row = tile_c * (2 * itemsize + 3 * 4)
    budget = 40 * 1024 * 1024      # fits v7x's 64 MiB VMEM, roomy on v5e/v6e
    tile_n = (budget // bytes_per_row) // 16 * 16
    tile_n = int(max(16, min(tile_n, 1024, _round_up(n, 16))))
    # Keep at least 2 row tiles when possible so the "parallel" N axis can be
    # sharded across the two v7x TensorCores (no effect on v5e/v6e).
    if n > 16 and pl.cdiv(n, tile_n) < 2:
        tile_n = int(max(16, _round_up(pl.cdiv(n, 2), 16)))
    return tile_n, tile_c


def cross_entropy_loss(x, y, *, tile_n=None, tile_c=None,
                       vmem_limit_bytes=None):
    """x: [N, C] float logits, y: [N] int class indices -> scalar mean loss."""
    n, c = x.shape
    itemsize = jnp.dtype(x.dtype).itemsize

    auto_n, auto_c = _select_tiles(n, c, itemsize)
    if tile_c is None:
        tile_c = auto_c
    if tile_n is None:
        tile_n = auto_n

    masked_last = (c % tile_c) != 0

    if vmem_limit_bytes is None:
        # Size the scoped VMEM from the actual need (double-buffered block +
        # f32 temporaries + slack), capped well below v7x's 64 MiB physical.
        need = tile_n * tile_c * (2 * itemsize + 3 * 4)
        vmem_limit_bytes = int(min(max(need + (4 << 20), 32 << 20), 48 << 20))

    grid = (pl.cdiv(n, tile_n), pl.cdiv(c, tile_c))
    kernel = functools.partial(_lse_kernel, num_classes=c, tile_c=tile_c,
                               masked_last=masked_last)

    lse = pl.pallas_call(
        kernel,
        out_shape=jax.ShapeDtypeStruct((n, 1), jnp.float32),
        grid_spec=pltpu.PrefetchScalarGridSpec(
            num_scalar_prefetch=0,
            grid=grid,
            in_specs=[pl.BlockSpec((tile_n, tile_c), lambda i, j: (i, j))],
            out_specs=pl.BlockSpec((tile_n, 1), lambda i, j: (i, 0)),
            scratch_shapes=[
                pltpu.VMEM((tile_n, 1), jnp.float32),  # running max
                pltpu.VMEM((tile_n, 1), jnp.float32),  # running sum-exp
            ],
        ),
        compiler_params=pltpu.CompilerParams(
            dimension_semantics=("parallel", "arbitrary"),
            vmem_limit_bytes=vmem_limit_bytes,
        ),
        cost_estimate=pl.CostEstimate(
            flops=5 * n * c,
            transcendentals=n * c,
            bytes_accessed=n * c * itemsize + n * 4,
        ),
    )(x)

    # Target-logit gather: an N-element gather, done once outside the kernel.
    tgt = jnp.take_along_axis(
        x, y.astype(jnp.int32).reshape(n, 1), axis=-1).astype(jnp.float32)

    # TODO(synk): ignore_index=-100 semantics of torch defaults not handled;
    #             out-of-range targets are assumed absent.
    return jnp.mean(lse[:, 0] - tgt[:, 0])


def _reference(x, y):
    x = x.astype(jnp.float32)
    lse = jax.scipy.special.logsumexp(x, axis=-1)
    tgt = jnp.take_along_axis(x, y[:, None].astype(jnp.int32), axis=-1)[:, 0]
    return jnp.mean(lse - tgt)


if __name__ == "__main__":
    key = jax.random.PRNGKey(0)
    k1, k2, k3, k4, k5, k6 = jax.random.split(key, 6)

    # Case 1: small, single-tile path (matches the module's typical toy shape).
    N1, C1 = 16, 32
    x1 = jax.random.normal(k1, (N1, C1), dtype=jnp.float32)
    y1 = jax.random.randint(k2, (N1,), 0, C1, dtype=jnp.int32)
    loss1 = jax.block_until_ready(cross_entropy_loss(x1, y1))
    ref1 = jax.block_until_ready(_reference(x1, y1))
    assert jnp.allclose(loss1, ref1, atol=1e-5, rtol=1e-5), (loss1, ref1)

    # Case 2: multi-tile grid, online-LSE over C, ragged N / C (masked last
    # C tile path).
    N2, C2 = 40, 300
    x2 = jax.random.normal(k3, (N2, C2), dtype=jnp.float32)
    y2 = jax.random.randint(k4, (N2,), 0, C2, dtype=jnp.int32)
    loss2 = jax.block_until_ready(
        cross_entropy_loss(x2, y2, tile_n=16, tile_c=128))
    ref2 = jax.block_until_ready(_reference(x2, y2))
    assert jnp.allclose(loss2, ref2, atol=1e-5, rtol=1e-5), (loss2, ref2)

    # Case 3: multi-C-tile, evenly divisible classes (unmasked steady-state
    # path) in bf16 input / f32 compute.
    N3, C3 = 32, 256
    x3 = jax.random.normal(k5, (N3, C3), dtype=jnp.float32).astype(jnp.bfloat16)
    y3 = jax.random.randint(k6, (N3,), 0, C3, dtype=jnp.int32)
    loss3 = jax.block_until_ready(
        cross_entropy_loss(x3, y3, tile_n=16, tile_c=128))
    ref3 = jax.block_until_ready(_reference(x3.astype(jnp.float32), y3))
    assert jnp.allclose(loss3, ref3, atol=2e-2, rtol=2e-2), (loss3, ref3)

    print("KERNEL_OK")
</pallas_src>

<mosaic_0001>
module attributes {stable_mosaic.version = 11 : i64} {
  func.func @_lse_kernel(%arg0: i32, %arg1: i32, %arg2: memref<16x128xf32, #tpu.memory_space<vmem>>, %arg3: memref<16x1xf32, #tpu.memory_space<vmem>>, %arg4: memref<16x1xf32, #tpu.memory_space<vmem>>, %arg5: memref<16x1xf32, #tpu.memory_space<vmem>>) attributes {dimension_semantics = [#tpu.dimension_semantics<parallel>, #tpu.dimension_semantics<arbitrary>], iteration_bounds = array<i64: 1, 1>, scalar_prefetch = 0 : i64, scratch_operands = 2 : i64, tpu.core_type = #tpu.core_type<tc>, window_params = [{transform_indices = @transform_0, window_bounds = array<i64: 16, 128>}, {transform_indices = @transform_1, window_bounds = array<i64: 16, 1>}]} {
    %c0_i32 = arith.constant 0 : i32
    %0 = arith.cmpi eq, %arg1, %c0_i32 : i32
    %1 = arith.extui %0 : i1 to i32
    %c0_i32_0 = arith.constant 0 : i32
    %2 = arith.cmpi ne, %1, %c0_i32_0 : i32
    scf.if %2 {
      %cst = arith.constant 0xFF800000 : f32
      %13 = vector.broadcast %cst : f32 to vector<16x1xf32>
      %c0_8 = arith.constant 0 : index
      %c0_9 = arith.constant 0 : index
      %14 = vector.load %arg4[%c0_8, %c0_9] : memref<16x1xf32, #tpu.memory_space<vmem>>, vector<16x1xf32>
      tpu.vector_store %arg4[%c0_8, %c0_9], %13 {strides = array<i32>} : memref<16x1xf32, #tpu.memory_space<vmem>>, vector<16x1xf32>,
      %cst_10 = arith.constant 0.000000e+00 : f32
      %15 = vector.broadcast %cst_10 : f32 to vector<16x1xf32>
      %c0_11 = arith.constant 0 : index
      %c0_12 = arith.constant 0 : index
      %16 = vector.load %arg5[%c0_11, %c0_12] : memref<16x1xf32, #tpu.memory_space<vmem>>, vector<16x1xf32>
      tpu.vector_store %arg5[%c0_11, %c0_12], %15 {strides = array<i32>} : memref<16x1xf32, #tpu.memory_space<vmem>>, vector<16x1xf32>,
    } else {
    }
    %c0 = arith.constant 0 : index
    %c0_1 = arith.constant 0 : index
    %3 = vector.load %arg2[%c0, %c0_1] : memref<16x128xf32, #tpu.memory_space<vmem>>, vector<16x128xf32>
    %c0_i32_2 = arith.constant 0 : i32
    %4 = arith.cmpi slt, %arg1, %c0_i32_2 : i32
    %5 = arith.extui %4 : i1 to i32
    %c0_i32_3 = arith.constant 0 : i32
    %6 = arith.cmpi ne, %5, %c0_i32_3 : i32
    scf.if %6 {
      %c0_8 = arith.constant 0 : index
      %c0_9 = arith.constant 0 : index
      %13 = vector.load %arg4[%c0_8, %c0_9] : memref<16x1xf32, #tpu.memory_space<vmem>>, vector<16x1xf32>
      %cst = arith.constant dense<0xFF800000> : vector<16xf32>
      %14 = vector.multi_reduction <maximumf>, %3, %cst [1] : vector<16x128xf32> to vector<16xf32>
      %15 = vector.shape_cast %14 : vector<16xf32> to vector<16x1xf32>
      %16 = arith.maximumf %13, %15 : vector<16x1xf32>
      %17 = vector.broadcast %16 : vector<16x1xf32> to vector<16x128xf32>
      %18 = arith.subf %3, %17 : vector<16x128xf32>
      %19 = math.exp %18 : vector<16x128xf32>
      %20 = arith.subf %13, %16 : vector<16x1xf32>
      %21 = math.exp %20 : vector<16x1xf32>
      %c0_10 = arith.constant 0 : index
      %c0_11 = arith.constant 0 : index
      %22 = vector.load %arg5[%c0_10, %c0_11] : memref<16x1xf32, #tpu.memory_space<vmem>>, vector<16x1xf32>
      %23 = arith.mulf %21, %22 : vector<16x1xf32>
      %cst_12 = arith.constant dense<0.000000e+00> : vector<16xf32>
      %24 = vector.multi_reduction <add>, %19, %cst_12 [1] : vector<16x128xf32> to vector<16xf32>
      %25 = vector.shape_cast %24 : vector<16xf32> to vector<16x1xf32>
      %26 = arith.addf %23, %25 : vector<16x1xf32>
      %c0_13 = arith.constant 0 : index
      %c0_14 = arith.constant 0 : index
      %27 = vector.load %arg5[%c0_13, %c0_14] : memref<16x1xf32, #tpu.memory_space<vmem>>, vector<16x1xf32>
      tpu.vector_store %arg5[%c0_13, %c0_14], %26 {strides = array<i32>} : memref<16x1xf32, #tpu.memory_space<vmem>>, vector<16x1xf32>,
      %c0_15 = arith.constant 0 : index
      %c0_16 = arith.constant 0 : index
      %28 = vector.load %arg4[%c0_15, %c0_16] : memref<16x1xf32, #tpu.memory_space<vmem>>, vector<16x1xf32>
      tpu.vector_store %arg4[%c0_15, %c0_16], %16 {strides = array<i32>} : memref<16x1xf32, #tpu.memory_space<vmem>>, vector<16x1xf32>,
    } else {
    }
    %c0_i32_4 = arith.constant 0 : i32
    %7 = arith.cmpi eq, %arg1, %c0_i32_4 : i32
    %8 = arith.extui %7 : i1 to i32
    %c0_i32_5 = arith.constant 0 : i32
    %9 = arith.cmpi ne, %8, %c0_i32_5 : i32
    scf.if %9 {
      %13 = tpu.iota {dimensions = array<i32: 1>} : vector<1x128xi32>
      %c128_i32 = arith.constant 128 : i32
      %14 = arith.muli %arg1, %c128_i32 : i32
      %15 = vector.broadcast %14 : i32 to vector<1x128xi32>
      %16 = arith.addi %13, %15 : vector<1x128xi32>
      %c32_i32 = arith.constant 32 : i32
      %17 = vector.broadcast %c32_i32 : i32 to vector<1x128xi32>
      %18 = arith.cmpi slt, %16, %17 : vector<1x128xi32>
      %cst = arith.constant 0xFF800000 : f32
      %19 = vector.shape_cast %18 : vector<1x128xi1> to vector<1x128xi1>
      %20 = vector.broadcast %19 : vector<1x128xi1> to vector<16x128xi1>
      %21 = vector.broadcast %cst : f32 to vector<16x128xf32>
      %22 = arith.select %20, %3, %21 : vector<16x128xi1>, vector<16x128xf32>
      %c0_8 = arith.constant 0 : index
      %c0_9 = arith.constant 0 : index
      %23 = vector.load %arg4[%c0_8, %c0_9] : memref<16x1xf32, #tpu.memory_space<vmem>>, vector<16x1xf32>
      %cst_10 = arith.constant dense<0xFF800000> : vector<16xf32>
      %24 = vector.multi_reduction <maximumf>, %22, %cst_10 [1] : vector<16x128xf32> to vector<16xf32>
      %25 = vector.shape_cast %24 : vector<16xf32> to vector<16x1xf32>
      %26 = arith.maximumf %23, %25 : vector<16x1xf32>
      %27 = vector.broadcast %26 : vector<16x1xf32> to vector<16x128xf32>
      %28 = arith.subf %22, %27 : vector<16x128xf32>
      %29 = math.exp %28 : vector<16x128xf32>
      %30 = arith.subf %23, %26 : vector<16x1xf32>
      %31 = math.exp %30 : vector<16x1xf32>
      %c0_11 = arith.constant 0 : index
      %c0_12 = arith.constant 0 : index
      %32 = vector.load %arg5[%c0_11, %c0_12] : memref<16x1xf32, #tpu.memory_space<vmem>>, vector<16x1xf32>
      %33 = arith.mulf %31, %32 : vector<16x1xf32>
      %cst_13 = arith.constant dense<0.000000e+00> : vector<16xf32>
      %34 = vector.multi_reduction <add>, %29, %cst_13 [1] : vector<16x128xf32> to vector<16xf32>
      %35 = vector.shape_cast %34 : vector<16xf32> to vector<16x1xf32>
      %36 = arith.addf %33, %35 : vector<16x1xf32>
      %c0_14 = arith.constant 0 : index
      %c0_15 = arith.constant 0 : index
      %37 = vector.load %arg5[%c0_14, %c0_15] : memref<16x1xf32, #tpu.memory_space<vmem>>, vector<16x1xf32>
      tpu.vector_store %arg5[%c0_14, %c0_15], %36 {strides = array<i32>} : memref<16x1xf32, #tpu.memory_space<vmem>>, vector<16x1xf32>,
      %c0_16 = arith.constant 0 : index
      %c0_17 = arith.constant 0 : index
      %38 = vector.load %arg4[%c0_16, %c0_17] : memref<16x1xf32, #tpu.memory_space<vmem>>, vector<16x1xf32>
      tpu.vector_store %arg4[%c0_16, %c0_17], %26 {strides = array<i32>} : memref<16x1xf32, #tpu.memory_space<vmem>>, vector<16x1xf32>,
    } else {
    }
    %c0_i32_6 = arith.constant 0 : i32
    %10 = arith.cmpi eq, %arg1, %c0_i32_6 : i32
    %11 = arith.extui %10 : i1 to i32
    %c0_i32_7 = arith.constant 0 : i32
    %12 = arith.cmpi ne, %11, %c0_i32_7 : i32
    scf.if %12 {
      %c0_8 = arith.constant 0 : index
      %c0_9 = arith.constant 0 : index
      %13 = vector.load %arg4[%c0_8, %c0_9] : memref<16x1xf32, #tpu.memory_space<vmem>>, vector<16x1xf32>
      %c0_10 = arith.constant 0 : index
      %c0_11 = arith.constant 0 : index
      %14 = vector.load %arg5[%c0_10, %c0_11] : memref<16x1xf32, #tpu.memory_space<vmem>>, vector<16x1xf32>
      %15 = math.log %14 : vector<16x1xf32>
      %16 = arith.addf %13, %15 : vector<16x1xf32>
      %c0_12 = arith.constant 0 : index
      %c0_13 = arith.constant 0 : index
      %17 = vector.load %arg3[%c0_12, %c0_13] : memref<16x1xf32, #tpu.memory_space<vmem>>, vector<16x1xf32>
      tpu.vector_store %arg3[%c0_12, %c0_13], %16 {strides = array<i32>} : memref<16x1xf32, #tpu.memory_space<vmem>>, vector<16x1xf32>,
    } else {
    }
    return
  }
  func.func @transform_0(%arg0: i32, %arg1: i32) -> (i32, i32) {
    %c0_i32 = arith.constant 0 : i32
    return %arg0, %arg1 : i32, i32
  }
  func.func @transform_1(%arg0: i32, %arg1: i32) -> (i32, i32) {
    %c0_i32 = arith.constant 0 : i32
    %c0_i32_0 = arith.constant 0 : i32
    return %arg0, %c0_i32 : i32, i32
  }
}

</mosaic_0001>

<bundles_post_ra>
// kernel: tpu_custom_call.1
= control target key start
LH: loop header
LB: loop body
LE: loop exit
PB: predicated region body
PF: predicated region fallthrough
CT: control target
= control target key end

     0   :  { %6 = vsyncpa [#allocation5], 0  ;;  %s201_s6 = smov [#allocation4]   ;;  %s245_s0 = inlined_call_operand.hbm [shape: f32[16,32], index: 0, kind: input, shape index: {}]   ;;  %s246_s1 = inlined_call_operand.vmem [shape: f32[16,1], index: 1, kind: output, shape index: {}]  }
   0x1   :  { %s12_s7 = sshll.u32 %s201_s6, 4  ;;  %s177_s10 = scalar_lea.hbm %s245_s0, 256  ;;  %s13_s7 = int_to_ptr.vmem [resolvable:$true] %s12_s7 }
   0x2   :  { %p178_p0 = scmp.ne.s32.totalorder %s245_s0, %s177_s10  ;;  %p181_p1 = scmp.lt.u32.totalorder %s177_s10, %s245_s0 }
   0x4   :  { %p183_p2 = pnand %p181_p1, %p178_p0 }
   0x6   :  { %186 = shalt.err (!%p183_p2)
}
   0x7   :  { %s187_s15 = scalar_lea.vmem %s13_s7, 256  ;;  %p192_p4 = scmp.lt.s32.totalorder %s13_s7, %s13_s7 }
   0x8   :  { %p188_p3 = scmp.ne.s32.totalorder %s13_s7, %s187_s15  ;;  %p193_p5 = scmp.lt.s32.totalorder %s187_s15, %s187_s15 }
   0xa   :  { %p194_p6 = por %p193_p5, %p192_p4 }
   0xc   :  { %p195_p7 = pnand %p194_p6, %p188_p3 }
   0xe   :  { %198 = shalt.err (!%p195_p7)
}
   0xf   :  { %s202_s16 = smov 128   ;;  %s203_s17 = smov 8  }
  0x10   :  { %18 = dma.hbm_to_vmem [thread:$0]  %s245_s0, 256, %s13_s7, [#allocation5], %s202_s16, %s202_s16, %s203_s17  }
  0x11   :  { %199 = dma.done.wait [#allocation5], 256  }
  0x12   :  { %200 = vsyncadd [#allocation5], 4294967040  ;;  %v85_v0 = vlaneseq  ;;  %vm26_vm0 = vcmask 7168   ;;  %v204_v1 = vmov -inf   ;;  %v31_v3 = vld [vmem:[#allocation4] sm:$0xff]  ;;  %v32_v4 = vld [vmem:[#allocation4 + $0x8] sm:$0xff] }
  0x13   :  { %27 = vst.msk [vmem:[#allocation2] sm:$0xff] %vm26_vm0, %v204_v1  ;;  %28 = vst.msk [vmem:[#allocation2 + $0x8] sm:$0xff] %vm26_vm0, %v204_v1  ;;  %v205_v7 = vmov 0   ;;  %v206_v8 = vmov 0.0  }
  0x14   :  { %v86_v2 = vand.u32 127, %v85_v0  ;;  %163 = vset.pattern.permute.xlu1 %v205_v7  ;;  %164 = vset.pattern.permute.xlu0 %v205_v7  ;;  %29 = vst.msk [vmem:[#allocation3] sm:$0xff] %vm26_vm0, %v206_v8  ;;  %30 = vst.msk [vmem:[#allocation3 + $0x8] sm:$0xff] %vm26_vm0, %v206_v8 }
  0x16   :  { %vm90_vm1 = vcmp.lt.s32.totalorder %v86_v2, 32 }
  0x17   :  { %v93_v5 = vsel %vm90_vm1, %v31_v3, -inf  ;;  %v94_v6 = vsel %vm90_vm1, %v32_v4, -inf }
  0x18   :  { %97 = vmax.xlane.f32.xlu0 %v93_v5 }
  0x1a   :  { %v95_v9 = vld [vmem:[#allocation2] sm:$0xff]  ;;  %v96_v12 = vld [vmem:[#allocation2 + $0x8] sm:$0xff] }
  0x1b   :  { %v125_v28 = vld [vmem:[#allocation3] sm:$0xff]  ;;  %v126_v32 = vld [vmem:[#allocation3 + $0x8] sm:$0xff] }
  0x1c   :  { %99 = vmax.xlane.f32.xlu0 %v94_v6 }
  0xa5   :  { %v98_v10 = vpop.xlane.xlu0 %97 }
  0xa6   :  { %v101_v11 = vmax.f32 %v95_v9, %v98_v10 }
  0xa8   :  { %v119_v13 = vsub.f32 %v95_v9, %v101_v11  ;;  %138 = vst.msk [vmem:[#allocation2] sm:$0xff] %vm26_vm0, %v101_v11  ;;  %105 = vperm.xlu1 %163, %v101_v11  }
  0xa9   :  { %v100_v14 = vpop.xlane.xlu0 %99 }
  0xaa   :  { %v102_v15 = vmax.f32 %v96_v12, %v100_v14  ;;  %v121_v25 = vmul.f32 1.442695, %v119_v13 }
  0xac   :  { %v120_v16 = vsub.f32 %v96_v12, %v102_v15  ;;  %139 = vst.msk [vmem:[#allocation2 + $0x8] sm:$0xff] %vm26_vm0, %v102_v15  ;;  %110 = vperm.xlu1 %163, %v102_v15  }
  0xae   :  { %v123_v26 = vmul.f32 1.442695, %v120_v16 }
  0xaf   :  { %v140_v41 = vld [vmem:[#allocation2] sm:$0xff] }
  0xb3   :  { %v141_v45 = vld [vmem:[#allocation2 + $0x8] sm:$0xff] }
 0x127   :  { %v106_v17 = vpop.permute.xlu1 %105 }
 0x128   :  { %v113_v18 = vsub.f32 %v93_v5, %v106_v17 }
 0x12a   :  { %v115_v19 = vmul.f32 1.442695, %v113_v18 }
 0x12b   :  { %v111_v20 = vpop.permute.xlu1 %110 }
 0x12c   :  { %165 = vpow2.f32 %v115_v19  ;;  %v114_v21 = vsub.f32 %v94_v6, %v111_v20 }
 0x12e   :  { %v117_v22 = vmul.f32 1.442695, %v114_v21 }
 0x130   :  { %167 = vpow2.f32 %v117_v22 }
 0x131   :  { %169 = vpow2.f32 %v121_v25 }
 0x132   :  { %171 = vpow2.f32 %v123_v26 }
 0x136   :  { %v166_v23 = vpop.eup %165 }
 0x137   :  { %129 = vadd.xlane.f32.xlu0 %v166_v23 }
 0x13a   :  { %v168_v24 = vpop.eup %167 }
 0x13b   :  { %131 = vadd.xlane.f32.xlu1 %v168_v24  ;;  %v170_v27 = vpop.eup %169 }
 0x13c   :  { %v127_v29 = vmul.f32 %v170_v27, %v125_v28  ;;  %v172_v30 = vpop.eup %171 }
 0x13d   :  { %v128_v34 = vmul.f32 %v172_v30, %v126_v32 }
 0x1c4   :  { %v130_v31 = vpop.xlane.xlu0 %129 }
 0x1c5   :  { %v133_v33 = vadd.f32 %v130_v31, %v127_v29 }
 0x1c7   :  { %136 = vst.msk [vmem:[#allocation3] sm:$0xff] %vm26_vm0, %v133_v33 }
 0x1c8   :  { %v132_v35 = vpop.xlane.xlu1 %131 }
 0x1c9   :  { %v134_v36 = vadd.f32 %v132_v35, %v128_v34 }
 0x1cb   :  { %137 = vst.msk [vmem:[#allocation3 + $0x8] sm:$0xff] %vm26_vm0, %v134_v36 }
 0x1ce   :  { %v142_v37 = vld [vmem:[#allocation3] sm:$0xff] }
 0x1cf   :  { %173 = vlog2.f32 %v142_v37 }
 0x1d2   :  { %v143_v38 = vld [vmem:[#allocation3 + $0x8] sm:$0xff] }
 0x1d3   :  { %175 = vlog2.f32 %v143_v38 }
 0x1d9   :  { %v174_v39 = vpop.eup %173 }
 0x1da   :  { %v145_v40 = vmul.f32 0.6931472, %v174_v39 }
 0x1dc   :  { %v148_v42 = vadd.f32 %v145_v40, %v140_v41 }
 0x1dd   :  { %v176_v43 = vpop.eup %175 }
 0x1de   :  { %150 = vst.msk [vmem:[%s246_s1] sm:$0xff] %vm26_vm0, %v148_v42  ;;  %v147_v44 = vmul.f32 0.6931472, %v176_v43 }
 0x1e0   :  { %v149_v46 = vadd.f32 %v147_v44, %v141_v45 }
 0x1e2   :  { %151 = vst.msk [vmem:[%s246_s1 + $0x8] sm:$0xff] %vm26_vm0, %v149_v46 }
 0x1e3   :  { %156 = vsyncpa [#allocation5], 1 }

</bundles_post_ra>
